<compile_context>
chip_gen: v5e
topology: v5e:2x2
jax: 0.10.0
libtpu: 0.0.40
codegen_flags: <defaults>
</compile_context>

<pallas_src>
import jax
import jax.numpy as jnp
from jax.experimental import pallas as pl
from jax.experimental.pallas import tpu as pltpu


_LANE = 1024                    # lane width: multiple of 128 -> unmasked stores
_TILE_BYTES = 4 * 1024 * 1024   # ~4 MiB byte budget for the largest in/out tile


def _make_scalar_mul_kernel(c):
    def kernel(x_ref, o_ref):
        # Weak-scalar promotion (JAX == PyTorch here): bf16*float -> bf16,
        # int*float -> f32, int*int -> int, f32*float -> f32.
        o_ref[...] = (x_ref[...] * c).astype(o_ref.dtype)
    return kernel


def scalar_forward(x: jax.Array, c=1) -> jax.Array:
    """Equivalent of Scalar(c).forward(x): x * c with PyTorch scalar promotion."""
    if not isinstance(c, (bool, int, float)):
        # Concrete scalar array -> bake its value into the kernel as a constant.
        # TODO(synk): a traced (non-concrete) c would need an SMEM scalar operand.
        c = c.item()

    orig_shape = x.shape
    out_dtype = jnp.result_type(x.dtype, c)   # torch weak-scalar promotion
    n = x.size
    if n == 0:
        return (x * c).reshape(orig_shape)

    in_item = jnp.dtype(x.dtype).itemsize
    out_item = jnp.dtype(out_dtype).itemsize
    max_item = max(in_item, out_item)
    # Sublane granularity of the most tightly packed operand:
    # 8 for 32-bit, 16 for 16-bit, 32 for 8-bit dtypes.
    sublane = max(8, 32 // min(in_item, out_item))

    rows = pl.cdiv(n, _LANE)
    padded_n = rows * _LANE

    # Byte-budget tile sizing (~4 MiB for the largest of in/out tiles).
    budget_rows = max(sublane,
                      (_TILE_BYTES // (_LANE * max_item)) // sublane * sublane)
    tile_rows = min(budget_rows, rows)
    if tile_rows == rows and rows >= 2 * sublane:
        # A single-tile grid would idle one v7x TensorCore; split into ~2 tiles.
        tile_rows = pl.cdiv(pl.cdiv(rows, 2), sublane) * sublane
    num_tiles = pl.cdiv(rows, tile_rows)

    flat = x.reshape(-1)
    if padded_n != n:
        # Only the final sub-1024-element fragment is padded; typical ML tensor
        # sizes (numel % 1024 == 0) take the zero-copy path (no pad, no slice).
        flat = jnp.pad(flat, (0, padded_n - n))
    x2 = flat.reshape(rows, _LANE)

    out2 = pl.pallas_call(
        _make_scalar_mul_kernel(c),
        out_shape=jax.ShapeDtypeStruct((rows, _LANE), out_dtype),
        grid=(num_tiles,),
        in_specs=[pl.BlockSpec((tile_rows, _LANE), lambda i: (i, 0))],
        out_specs=pl.BlockSpec((tile_rows, _LANE), lambda i: (i, 0)),
        compiler_params=pltpu.CompilerParams(
            dimension_semantics=("parallel",),       # shard rows across TCs (v7x)
            vmem_limit_bytes=32 * 1024 * 1024,       # safe on v5e/v6e/v7x
        ),
        cost_estimate=pl.CostEstimate(
            flops=n, transcendentals=0,
            bytes_accessed=padded_n * (in_item + out_item)),
    )(x2)

    out_flat = out2.reshape(-1)
    if padded_n != n:
        out_flat = out_flat[:n]
    return out_flat.reshape(orig_shape)


if __name__ == "__main__":
    k0, k1, k2, k3 = jax.random.split(jax.random.PRNGKey(0), 4)
    c = 3.0

    # NCHW-style input consistent with the module's typical use (fast path:
    # numel = 2048 is a multiple of 1024 -> zero-copy, no pad, no slice).
    x = jax.random.normal(k0, (2, 4, 16, 16), dtype=jnp.float32)
    out = jax.block_until_ready(scalar_forward(x, c=c))
    assert out.shape == x.shape and out.dtype == x.dtype
    assert jnp.allclose(out, x * c, rtol=1e-6, atol=1e-6)

    # Ragged size (numel % 1024 != 0) exercising the tail-fragment pad path.
    x_odd = jax.random.normal(k1, (2, 3, 7, 7), dtype=jnp.float32)
    out_odd = jax.block_until_ready(scalar_forward(x_odd, c=c))
    assert out_odd.shape == x_odd.shape and out_odd.dtype == x_odd.dtype
    assert jnp.allclose(out_odd, x_odd * c, rtol=1e-6, atol=1e-6)

    # bf16 input: multiply stays in bf16 (no f32 round-trip).
    x_bf16 = jax.random.normal(k2, (2, 4, 16, 16), dtype=jnp.bfloat16)
    out_bf16 = jax.block_until_ready(scalar_forward(x_bf16, c=c))
    assert out_bf16.shape == x_bf16.shape and out_bf16.dtype == jnp.bfloat16
    assert jnp.allclose(out_bf16.astype(jnp.float32),
                        (x_bf16 * c).astype(jnp.float32),
                        rtol=1e-2, atol=1e-2)

    # Integer tensor * Python float promotes to float32 (PyTorch semantics).
    x_int = jax.random.randint(k3, (2, 4, 16, 16), -10, 10, dtype=jnp.int32)
    out_int = jax.block_until_ready(scalar_forward(x_int, c=2.5))
    assert out_int.shape == x_int.shape and out_int.dtype == jnp.float32
    assert jnp.allclose(out_int, x_int.astype(jnp.float32) * 2.5,
                        rtol=1e-6, atol=1e-6)

    print("KERNEL_OK")
</pallas_src>

<mosaic_0001>
module attributes {stable_mosaic.version = 11 : i64} {
  func.func @kernel(%arg0: i32, %arg1: memref<2x1024xf32, #tpu.memory_space<vmem>>, %arg2: memref<2x1024xf32, #tpu.memory_space<vmem>>) attributes {dimension_semantics = [#tpu.dimension_semantics<parallel>], iteration_bounds = array<i64: 1>, scalar_prefetch = 0 : i64, scratch_operands = 0 : i64, tpu.core_type = #tpu.core_type<tc>, window_params = [{transform_indices = @transform_0, window_bounds = array<i64: 2, 1024>}, {transform_indices = @transform_1, window_bounds = array<i64: 2, 1024>}]} {
    %c0 = arith.constant 0 : index
    %c0_0 = arith.constant 0 : index
    %0 = vector.load %arg1[%c0, %c0_0] : memref<2x1024xf32, #tpu.memory_space<vmem>>, vector<2x1024xf32>
    %cst = arith.constant 3.000000e+00 : f32
    %1 = vector.broadcast %cst : f32 to vector<2x1024xf32>
    %2 = arith.mulf %0, %1 : vector<2x1024xf32>
    %c0_1 = arith.constant 0 : index
    %c0_2 = arith.constant 0 : index
    %3 = vector.load %arg2[%c0_1, %c0_2] : memref<2x1024xf32, #tpu.memory_space<vmem>>, vector<2x1024xf32>
    tpu.vector_store %arg2[%c0_1, %c0_2], %2 {strides = array<i32>} : memref<2x1024xf32, #tpu.memory_space<vmem>>, vector<2x1024xf32>,
    return
  }
  func.func @transform_0(%arg0: i32) -> (i32, i32) {
    %c0_i32 = arith.constant 0 : i32
    %c0_i32_0 = arith.constant 0 : i32
    return %arg0, %c0_i32 : i32, i32
  }
  func.func @transform_1(%arg0: i32) -> (i32, i32) {
    %c0_i32 = arith.constant 0 : i32
    %c0_i32_0 = arith.constant 0 : i32
    return %arg0, %c0_i32 : i32, i32
  }
}

</mosaic_0001>

<bundles_post_ra>
// kernel: tpu_custom_call.1
= control target key start
LH: loop header
LB: loop body
LE: loop exit
PB: predicated region body
PF: predicated region fallthrough
CT: control target
= control target key end

     0   :  { %6 = vsyncpa [#allocation3], 0  ;;  %s118_s0 = inlined_call_operand.hbm [shape: f32[2,1024], index: 0, kind: input, shape index: {}]   ;;  %s119_s1 = inlined_call_operand.hbm [shape: f32[2,1024], index: 1, kind: output, shape index: {}]  }
   0x1   :  { %7 = vsyncpa [#allocation4], 0  ;;  %s13_s8 = sshll.u32 %s118_s0, 4  ;;  %s100_s9 = smov [#allocation2]   ;;  %s14_s8 = int_to_ptr.hbm [resolvable:$true] %s13_s8 }
   0x2   :  { %s15_s10 = sshll.u32 %s100_s9, 4  ;;  %s16_s10 = int_to_ptr.vmem [resolvable:$true] %s15_s10 }
   0x3   :  { %18 = dma.hbm_to_vmem [thread:$0]  %s14_s8, 256, %s16_s10, [#allocation3]  }
   0x4   :  { %96 = dma.done.wait [#allocation3], 256  }
   0x5   :  { %97 = vsyncadd [#allocation3], 4294967040  ;;  %s101_s11 = smov [#allocation5]   ;;  %s36_s15 = sshll.u32 %s119_s1, 4  ;;  %v23_v0 = vld [vmem:[#allocation2] sm:$0xff]  ;;  %v24_v1 = vld [vmem:[#allocation2 + $0x8] sm:$0xff]  ;;  %s37_s15 = int_to_ptr.hbm [resolvable:$true] %s36_s15 }
   0x6   :  { %s34_s12 = sshll.u32 %s101_s11, 4  ;;  %v25_v2 = vmul.f32 3.0, %v23_v0  ;;  %v26_v3 = vmul.f32 3.0, %v24_v1  ;;  %s35_s12 = int_to_ptr.vmem [resolvable:$true] %s34_s12 }
   0x8   :  { %27 = vst [vmem:[#allocation5] sm:$0xff] %v25_v2 }
   0x9   :  { %28 = vst [vmem:[#allocation5 + $0x8] sm:$0xff] %v26_v3 }
   0xa   :  { %39 = dma.vmem_to_hbm [thread:$0]  %s35_s12, 256, %s37_s15, [#allocation4]  }
   0xb   :  { %98 = dma.done.wait [#allocation4], 256  }
   0xc   :  { %99 = vsyncadd [#allocation4], 4294967040 }
   0xd   :  { %44 = vsyncpa [#allocation3], 1 }
   0xe   :  { %45 = vsyncpa [#allocation4], 1 }

</bundles_post_ra>
